<compile_context>
chip_gen: v5e
topology: v5e:2x2
jax: 0.10.0
libtpu: 0.0.40
codegen_flags: <defaults>
</compile_context>

<pallas_src>
import functools
import operator

import jax
import jax.numpy as jnp
from jax import lax
from jax.experimental import pallas as pl
from jax.experimental.pallas import tpu as pltpu


# ----------------------------------------------------------------------------
# Per-generation VMEM sizing
# ----------------------------------------------------------------------------
@functools.lru_cache(maxsize=None)
def _vmem_limit_bytes():
    """Scoped-VMEM limit: ~75% of physical VMEM, capped at 96 MiB."""
    try:
        cap = int(pltpu.get_tpu_info().vmem_capacity_bytes)
    except Exception:
        cap = 64 * 1024 * 1024          # conservative (v7x-sized) fallback
    return min(cap * 3 // 4, 96 * 1024 * 1024)


def _sublane_align(dtype):
    # Packed sub-32-bit dtypes want 16/32-row granules to avoid padded layouts.
    return max(8, 32 // jnp.dtype(dtype).itemsize)


def _pick_block(dim, pref, align):
    """Largest multiple of `align` that is <= min(dim, pref); full dim if tiny."""
    if dim <= align:
        return dim
    return max(align, (min(dim, pref) // align) * align)


# ----------------------------------------------------------------------------
# Matmul path (MXU)
# ----------------------------------------------------------------------------
def _mask_k_operands(x, y, kk, tk, k_total):
    """Zero out the ragged K tail (padding in the last K block is undefined)."""
    k_base = kk * tk
    kx = lax.broadcasted_iota(jnp.int32, x.shape, 1)
    ky = lax.broadcasted_iota(jnp.int32, y.shape, 0)
    x = jnp.where(k_base + kx < k_total, x, jnp.zeros_like(x))
    y = jnp.where(k_base + ky < k_total, y, jnp.zeros_like(y))
    return x, y


def _matmul_kernel_acc(x_ref, y_ref, o_ref, acc_ref, *, k_total, tk, mask_k):
    kk = pl.program_id(2)

    @pl.when(kk == 0)
    def _():
        acc_ref[...] = jnp.zeros_like(acc_ref)

    x = x_ref[...]
    y = y_ref[...]
    if mask_k:                                   # static Python flag
        x, y = _mask_k_operands(x, y, kk, tk, k_total)

    acc_ref[...] += jnp.dot(x, y, preferred_element_type=jnp.float32)

    @pl.when(kk == pl.num_programs(2) - 1)
    def _():
        o_ref[...] = acc_ref[...].astype(o_ref.dtype)


def _matmul_kernel_f32out(x_ref, y_ref, o_ref, *, k_total, tk, mask_k):
    # float32 output: accumulate straight into the VMEM-resident output block,
    # saving one (tm, tn) f32 scratch buffer and the final cast/copy epilogue.
    kk = pl.program_id(2)

    @pl.when(kk == 0)
    def _():
        o_ref[...] = jnp.zeros_like(o_ref)

    x = x_ref[...]
    y = y_ref[...]
    if mask_k:
        x, y = _mask_k_operands(x, y, kk, tk, k_total)

    o_ref[...] += jnp.dot(x, y, preferred_element_type=jnp.float32)


def _pallas_matmul(x, y):
    if x.ndim != 2 or y.ndim != 2:
        # TODO(synk): batched (>=3-D) matmul operands are not tiled here.
        raise NotImplementedError("only 2-D @ 2-D matmul is implemented")
    m, k = x.shape
    k2, n = y.shape
    if k != k2:
        raise ValueError("inner dims must match for matmul")
    out_dtype = jnp.result_type(x.dtype, y.dtype)

    limit = _vmem_limit_bytes()
    big = limit >= 64 * 1024 * 1024      # v5e/v6e: bigger K/N panels; v7x: modest

    sub_m = _sublane_align(x.dtype)
    tm = _pick_block(m, 256, sub_m)
    tn = _pick_block(n, 512 if big else 256, 128)
    tk = _pick_block(k, 1024 if big else 512, 128)

    # v7x has 2 TensorCores: ensure at least one *parallel* axis has >= 2
    # blocks so both cores get work (harmless on single-TC v5e/v6e).
    if pl.cdiv(m, tm) * pl.cdiv(n, tn) == 1:
        if tm >= 2 * sub_m and tm % (2 * sub_m) == 0:
            tm //= 2
        elif tn >= 256 and tn % 256 == 0:
            tn //= 2

    grid = (pl.cdiv(m, tm), pl.cdiv(n, tn), pl.cdiv(k, tk))
    mask_k = (k % tk) != 0
    f32_out = out_dtype == jnp.float32

    kernel = functools.partial(
        _matmul_kernel_f32out if f32_out else _matmul_kernel_acc,
        k_total=k, tk=tk, mask_k=mask_k)

    cost = pl.CostEstimate(
        flops=2 * m * n * k,
        transcendentals=0,
        bytes_accessed=(m * k * x.dtype.itemsize
                        + k * n * y.dtype.itemsize
                        + m * n * jnp.dtype(out_dtype).itemsize),
    )

    scratch = [] if f32_out else [pltpu.VMEM((tm, tn), jnp.float32)]

    # TODO(synk): v7x's MXU has no integer path; int8 operands should be
    # upcast to bf16 on that generation only (left native for v5e/v6e).
    return pl.pallas_call(
        kernel,
        out_shape=jax.ShapeDtypeStruct((m, n), out_dtype),
        grid_spec=pltpu.PrefetchScalarGridSpec(
            num_scalar_prefetch=0,
            grid=grid,
            in_specs=[
                pl.BlockSpec((tm, tk), lambda i, j, kk: (i, kk)),
                pl.BlockSpec((tk, tn), lambda i, j, kk: (kk, j)),
            ],
            out_specs=pl.BlockSpec((tm, tn), lambda i, j, kk: (i, j)),
            scratch_shapes=scratch,
        ),
        compiler_params=pltpu.CompilerParams(
            dimension_semantics=("parallel", "parallel", "arbitrary"),
            vmem_limit_bytes=limit,
        ),
        cost_estimate=cost,
    )(x, y)


# ----------------------------------------------------------------------------
# Elementwise path (VPU)
# ----------------------------------------------------------------------------
def _ew_kernel(op, x_ref, y_ref, o_ref):
    # Broadcasting of (1,tn)/(tm,1)/(1,1) operand blocks happens here in VMEM.
    o_ref[...] = op(x_ref[...], y_ref[...]).astype(o_ref.dtype)


def _classify(arr, out_shape, m, n):
    """How does `arr` broadcast against the (m, n) output slab?
    Returns (kind, arr reshaped 2-D) WITHOUT materializing the broadcast."""
    if arr.size == 1:
        return "scalar", arr.reshape(1, 1)
    pad = (1,) * (len(out_shape) - arr.ndim) + tuple(arr.shape)
    if pad == tuple(out_shape):
        return "full", arr.reshape(m, n)
    lead = 1
    for d in pad[:-1]:
        lead *= d
    if pad[-1] == n and lead == 1:
        return "row", arr.reshape(1, n)
    if pad[-1] == 1 and pad[:-1] == tuple(out_shape[:-1]):
        return "col", arr.reshape(m, 1)
    # TODO(synk): general middle-axis broadcasting falls back to materializing
    # the broadcast in HBM (rare for this module's binary-op pattern).
    return "full", jnp.broadcast_to(arr, out_shape).reshape(m, n)


def _ew_spec(kind, tm, tn):
    if kind == "full":
        return pl.BlockSpec((tm, tn), lambda i, j: (i, j))
    if kind == "row":
        return pl.BlockSpec((1, tn), lambda i, j: (0, j))
    if kind == "col":
        return pl.BlockSpec((tm, 1), lambda i, j: (i, 0))
    return pl.BlockSpec((1, 1), lambda i, j: (0, 0))          # scalar


def _pallas_elementwise(op, x, y):
    x = jnp.asarray(x)
    y = jnp.asarray(y)

    # Result shape / dtype exactly as the callable itself would produce.
    out_aval = jax.eval_shape(
        op,
        jax.ShapeDtypeStruct(x.shape, x.dtype),
        jax.ShapeDtypeStruct(y.shape, y.dtype),
    )
    out_shape, out_dtype = out_aval.shape, out_aval.dtype

    total = 1
    for d in out_shape:
        total *= d
    if total == 0:
        return jnp.zeros(out_shape, out_dtype)

    n = out_shape[-1] if out_shape else 1
    m = total // n

    xk, x2 = _classify(x, out_shape, m, n)
    yk, y2 = _classify(y, out_shape, m, n)

    # Lane-dense re-tiling: if the last dim is not lane aligned and nothing
    # broadcasts, reinterpret the flat buffer as (rows, L) with L a multiple
    # of 128 (pure metadata reshape, no extra HBM traffic, no padding).
    if n % 128 != 0 and xk == "full" and yk == "full" and total >= (1 << 15):
        for L in (4096, 2048, 1024, 512, 256, 128):
            if total % L == 0:
                n = L
                m = total // L
                x2 = x2.reshape(m, n)
                y2 = y2.reshape(m, n)
                break

    limit = _vmem_limit_bytes()
    budget = limit // 2                     # headroom for Mosaic internals

    tn = n if n <= 4096 else 4096           # lane tile (4096 is a mult of 128)
    out_item = jnp.dtype(out_dtype).itemsize
    row_bytes = tn * out_item
    if xk == "full":
        row_bytes += tn * x2.dtype.itemsize
    if yk == "full":
        row_bytes += tn * y2.dtype.itemsize
    tm_cap = max(8, budget // (2 * max(row_bytes, 1)))   # x2 for double-buffer
    if m <= tm_cap:
        tm = m                               # full dim block is always legal
    else:
        tm = max(8, min(tm_cap, 4096) // 8 * 8)

    grid = (pl.cdiv(m, tm), pl.cdiv(n, tn))  # ragged tails are masked, no pad

    cost = pl.CostEstimate(
        flops=total,
        transcendentals=0,
        bytes_accessed=(x.size * x.dtype.itemsize
                        + y.size * y.dtype.itemsize
                        + total * out_item),
    )

    out2 = pl.pallas_call(
        functools.partial(_ew_kernel, op),
        out_shape=jax.ShapeDtypeStruct((m, n), out_dtype),
        grid_spec=pltpu.PrefetchScalarGridSpec(
            num_scalar_prefetch=0,
            grid=grid,
            in_specs=[_ew_spec(xk, tm, tn), _ew_spec(yk, tm, tn)],
            out_specs=pl.BlockSpec((tm, tn), lambda i, j: (i, j)),
        ),
        compiler_params=pltpu.CompilerParams(
            dimension_semantics=("parallel", "parallel"),
            vmem_limit_bytes=limit,
        ),
        cost_estimate=cost,
    )(x2, y2)

    return out2.reshape(out_shape)


# ----------------------------------------------------------------------------
# Wrapper == Model.forward(x, inp1, inp2)
# ----------------------------------------------------------------------------
_MATMUL_LIKE = (jnp.matmul, jnp.dot, operator.matmul, lax.dot)


def _is_matmul_like(fn, x, y):
    for m in _MATMUL_LIKE:
        if fn is m:
            return True
    # Name-based heuristic only if the shapes really are 2-D matmul compatible
    # (avoids misrouting a user elementwise helper that happens to be named
    # "dot" when its operands cannot be matmul'd).
    if getattr(fn, "__name__", None) in ("matmul", "dot", "__matmul__"):
        return x.ndim == 2 and y.ndim == 2 and x.shape[1] == y.shape[0]
    return False


def model_forward(x, inp1, inp2):
    """Pallas equivalent of `Model.forward`: `return inp1(x, inp2)`."""
    x = jnp.asarray(x)
    y = jnp.asarray(inp2)
    if _is_matmul_like(inp1, x, y):
        return _pallas_matmul(x, y)
    return _pallas_elementwise(inp1, x, y)


# ----------------------------------------------------------------------------
# Demo / self-test
# ----------------------------------------------------------------------------
if __name__ == "__main__":
    key = jax.random.PRNGKey(0)
    k0, k1, k2, k3, k4, k5 = jax.random.split(key, 6)

    # Case 1: original spec shape — tiny 3x3 elementwise (full-block path).
    x0 = jax.random.normal(k0, (3, 3), dtype=jnp.float32)
    y0 = jax.random.normal(k1, (3, 3), dtype=jnp.float32)
    out0 = jax.block_until_ready(model_forward(x0, jnp.subtract, y0))
    assert jnp.allclose(out0, x0 - y0, atol=1e-5, rtol=1e-5)

    # Case 2: same-shape elementwise add (row/lane tiled grid).
    x1 = jax.random.normal(k2, (512, 384), dtype=jnp.float32)
    y1 = jax.random.normal(k3, (512, 384), dtype=jnp.float32)
    out1 = jax.block_until_ready(model_forward(x1, jnp.add, y1))
    assert jnp.allclose(out1, x1 + y1, atol=1e-5, rtol=1e-5)

    # Case 3: row-vector broadcast — small operand stays un-broadcast in HBM.
    y2 = jax.random.normal(k4, (384,), dtype=jnp.float32)
    out2 = jax.block_until_ready(model_forward(x1, jnp.multiply, y2))
    assert jnp.allclose(out2, x1 * y2, atol=1e-5, rtol=1e-5)

    # Case 4: column-vector broadcast.
    y3 = jax.random.normal(k5, (512, 1), dtype=jnp.float32)
    out3 = jax.block_until_ready(model_forward(x1, jnp.add, y3))
    assert jnp.allclose(out3, x1 + y3, atol=1e-5, rtol=1e-5)

    # Case 5: scalar broadcast.
    out4 = jax.block_until_ready(model_forward(x1, jnp.add, 2.5))
    assert jnp.allclose(out4, x1 + 2.5, atol=1e-5, rtol=1e-5)

    # Case 6: matmul-like callable, divisible shapes (parallel-axis split).
    a = jax.random.normal(k0, (256, 512), dtype=jnp.float32)
    b = jax.random.normal(k1, (512, 256), dtype=jnp.float32)
    out5 = jax.block_until_ready(model_forward(a, jnp.matmul, b))
    assert jnp.allclose(out5, a @ b, atol=1e-2, rtol=1e-2)

    # Case 7: matmul with ragged M/N/K (cdiv grid + masked K tail).
    a2 = jax.random.normal(k2, (200, 200), dtype=jnp.float32)
    b2 = jax.random.normal(k3, (200, 136), dtype=jnp.float32)
    out6 = jax.block_until_ready(model_forward(a2, jnp.matmul, b2))
    assert jnp.allclose(out6, a2 @ b2, atol=1e-2, rtol=1e-2)

    print("KERNEL_OK")
</pallas_src>

<mosaic_0001>
module attributes {stable_mosaic.version = 11 : i64} {
  func.func @_ew_kernel(%arg0: i32, %arg1: i32, %arg2: memref<3x3xf32, #tpu.memory_space<vmem>>, %arg3: memref<3x3xf32, #tpu.memory_space<vmem>>, %arg4: memref<3x3xf32, #tpu.memory_space<vmem>>) attributes {dimension_semantics = [#tpu.dimension_semantics<parallel>, #tpu.dimension_semantics<parallel>], iteration_bounds = array<i64: 1, 1>, scalar_prefetch = 0 : i64, scratch_operands = 0 : i64, tpu.core_type = #tpu.core_type<tc>, window_params = [{transform_indices = @transform_0, window_bounds = array<i64: 3, 3>}, {transform_indices = @transform_1, window_bounds = array<i64: 3, 3>}, {transform_indices = @transform_2, window_bounds = array<i64: 3, 3>}]} {
    %c0 = arith.constant 0 : index
    %c0_0 = arith.constant 0 : index
    %0 = vector.load %arg2[%c0, %c0_0] : memref<3x3xf32, #tpu.memory_space<vmem>>, vector<3x3xf32>
    %c0_1 = arith.constant 0 : index
    %c0_2 = arith.constant 0 : index
    %1 = vector.load %arg3[%c0_1, %c0_2] : memref<3x3xf32, #tpu.memory_space<vmem>>, vector<3x3xf32>
    %2 = arith.subf %0, %1 : vector<3x3xf32>
    %c0_3 = arith.constant 0 : index
    %c0_4 = arith.constant 0 : index
    %3 = vector.load %arg4[%c0_3, %c0_4] : memref<3x3xf32, #tpu.memory_space<vmem>>, vector<3x3xf32>
    tpu.vector_store %arg4[%c0_3, %c0_4], %2 {strides = array<i32>} : memref<3x3xf32, #tpu.memory_space<vmem>>, vector<3x3xf32>,
    return
  }
  func.func @transform_0(%arg0: i32, %arg1: i32) -> (i32, i32) {
    %c0_i32 = arith.constant 0 : i32
    return %arg0, %arg1 : i32, i32
  }
  func.func @transform_1(%arg0: i32, %arg1: i32) -> (i32, i32) {
    %c0_i32 = arith.constant 0 : i32
    return %arg0, %arg1 : i32, i32
  }
  func.func @transform_2(%arg0: i32, %arg1: i32) -> (i32, i32) {
    %c0_i32 = arith.constant 0 : i32
    return %arg0, %arg1 : i32, i32
  }
}

</mosaic_0001>

<bundles_post_ra>
// kernel: tpu_custom_call.1
= control target key start
LH: loop header
LB: loop body
LE: loop exit
PB: predicated region body
PF: predicated region fallthrough
CT: control target
= control target key end

     0   :  { %7 = vsyncpa [#allocation3], 0  ;;  %s171_s0 = inlined_call_operand.hbm [shape: f32[3,3], index: 0, kind: input, shape index: {}]   ;;  %s172_s1 = inlined_call_operand.hbm [shape: f32[3,3], index: 1, kind: input, shape index: {}]   ;;  %s173_s2 = inlined_call_operand.hbm [shape: f32[3,3], index: 2, kind: output, shape index: {}]  }
   0x1   :  { %8 = vsyncpa [#allocation6], 0 }
   0x2   :  { %9 = vsyncpa [#allocation4], 0  ;;  %s15_s11 = sshll.u32 %s171_s0, 4  ;;  %s144_s12 = smov [#allocation2]   ;;  %s16_s11 = int_to_ptr.hbm [resolvable:$true] %s15_s11 }
   0x3   :  { %s17_s13 = sshll.u32 %s144_s12, 4  ;;  %s26_s16 = sshll.u32 %s172_s1, 4  ;;  %s18_s13 = int_to_ptr.vmem [resolvable:$true] %s17_s13  ;;  %s27_s16 = int_to_ptr.hbm [resolvable:$true] %s26_s16 }
   0x4   :  { %20 = dma.hbm_to_vmem [thread:$0]  %s16_s11, 64, %s18_s13, [#allocation3]  }
   0x5   :  { %s145_s17 = smov [#allocation5]  }
   0x6   :  { %s28_s18 = sshll.u32 %s145_s17, 4  ;;  %s29_s18 = int_to_ptr.vmem [resolvable:$true] %s28_s18 }
   0x7   :  { %31 = dma.hbm_to_vmem [thread:$0]  %s27_s16, 64, %s29_s18, [#allocation6]  }
   0x8   :  { %138 = dma.done.wait [#allocation3], 64  }
   0x9   :  { %139 = vsyncadd [#allocation3], 4294967232 }
   0xa   :  { %140 = dma.done.wait [#allocation6], 64  }
   0xb   :  { %141 = vsyncadd [#allocation6], 4294967232  ;;  %s146_s19 = smov [#allocation7]   ;;  %s52_s22 = sshll.u32 %s173_s2, 4  ;;  %v40_v0 = vld [vmem:[#allocation2] sm:$0x7]  ;;  %s53_s22 = int_to_ptr.hbm [resolvable:$true] %s52_s22 }
   0xc   :  { %s50_s0 = sshll.u32 %s146_s19, 4  ;;  %v41_v1 = vld [vmem:[#allocation5] sm:$0x7]  ;;  %vm43_vm0 = vcmask 18432   ;;  %s51_s0 = int_to_ptr.vmem [resolvable:$true] %s50_s0 }
   0xd   :  { %v42_v2 = vsub.f32 %v40_v0, %v41_v1 }
   0xf   :  { %44 = vst.msk [vmem:[#allocation7] sm:$0x7] %vm43_vm0, %v42_v2 }
  0x10   :  { %55 = dma.vmem_to_hbm [thread:$0]  %s51_s0, 64, %s53_s22, [#allocation4]  }
  0x11   :  { %142 = dma.done.wait [#allocation4], 64  }
  0x12   :  { %143 = vsyncadd [#allocation4], 4294967232 }
  0x13   :  { %60 = vsyncpa [#allocation3], 1 }
  0x14   :  { %61 = vsyncpa [#allocation6], 1 }
  0x15   :  { %62 = vsyncpa [#allocation4], 1 }

</bundles_post_ra>
